<compile_context>
chip_gen: v5e
topology: v5e:2x2
jax: 0.10.0
libtpu: 0.0.40
codegen_flags: <defaults>
</compile_context>

<pallas_src>
import functools
import math

import jax
import jax.numpy as jnp
from jax.experimental import pallas as pl
from jax.experimental.pallas import tpu as pltpu


def _row_tile(hout: int) -> int:
    """Largest divisor of hout that is a multiple of 8, <= 64 and gives >= 2
    row tiles; falls back to the full extent (single tile)."""
    for th in range(min(hout // 2, 64), 7, -1):
        if hout % th == 0 and th % 8 == 0:
            return th
    return hout


def _conv_block_kernel(x_ref, w_ref, b_ref, o_ref, *, K, stride, dilation, TH, WoC):
    # x_ref: (1, Hp, Wp*Cin)        padded input, W and Cin flattened into lanes
    # w_ref: (K, Wp*Cin, Wout*Cout) block-Toeplitz weights (kw/stride/dil folded)
    # b_ref: (1, Wout*Cout)         bias tiled across Wout (f32)
    # o_ref: (1, TH, Wout*Cout)     lane-dense output row tile
    t = pl.program_id(1)
    row0 = pl.multiple_of(t * (TH * stride), TH * stride)

    acc = jnp.zeros((TH, WoC), jnp.float32)
    for kh in range(K):                       # K is small & static -> unrolled
        start = row0 + kh * dilation
        if stride == 1:
            rows = x_ref[0, pl.ds(start, TH), :]                    # (TH, Wp*Cin)
        else:
            # H-stride handled on the sublane axis only (no lane gathers).
            rows = x_ref[0, pl.ds(start, (TH - 1) * stride + 1), :][::stride]
        acc = acc + jnp.dot(rows, w_ref[kh],
                            preferred_element_type=jnp.float32)     # MXU, 2-D x 2-D

    acc = acc + b_ref[...]                                          # (1, WoC) bcast
    o_ref[0] = jnp.where(acc > 0.0, acc, 0.2 * acc).astype(o_ref.dtype)


def conv_block_pallas(x_nchw, weight_oihw, bias, *, stride, dilation,
                      compute_dtype=None):
    """Conv2d(padding=dilation*(K-1)//2, stride, dilation) + LeakyReLU(0.2).

    NCHW in / NCHW out (matches the PyTorch module). `compute_dtype=bfloat16`
    casts activations/weights for the MXU while accumulating in f32.
    """
    N, Cin, H, W = x_nchw.shape
    Cout, Cin_w, K, K2 = weight_oihw.shape
    assert Cin_w == Cin and K == K2

    pad = dilation * (K - 1) // 2
    Hout = (H + 2 * pad - dilation * (K - 1) - 1) // stride + 1
    Wout = (W + 2 * pad - dilation * (K - 1) - 1) // stride + 1
    Hp, Wp = H + 2 * pad, W + 2 * pad
    WpC, WoC = Wp * Cin, Wout * Cout
    cdt = compute_dtype if compute_dtype is not None else x_nchw.dtype

    # ---- layout glue (pure data movement / weight repacking, no conv math) ----
    x_nhwc = jnp.transpose(x_nchw, (0, 2, 3, 1))                    # (N, H, W, Cin)
    x_pad = jnp.pad(x_nhwc, ((0, 0), (pad, pad), (pad, pad), (0, 0)))
    x2 = x_pad.reshape(N, Hp, WpC).astype(cdt)                      # lane-packed

    # Block-Toeplitz weights: fold kw taps + W-stride + W-dilation.
    w_hwio = jnp.transpose(weight_oihw, (2, 3, 1, 0))               # (K, K, Cin, Cout)
    in_col = jnp.arange(Wp)
    out_col = jnp.arange(Wout)
    wt = jnp.zeros((K, Wp, Cin, Wout, Cout), jnp.float32)
    for kw in range(K):
        sel = (in_col[:, None] == out_col[None, :] * stride + kw * dilation)
        wt = wt + jnp.einsum('vw,kio->kviwo', sel.astype(jnp.float32),
                             w_hwio[:, kw, :, :].astype(jnp.float32))
    wt = wt.reshape(K, WpC, WoC).astype(cdt)                        # (K, Wp*Cin, Wout*Cout)

    b2 = jnp.tile(bias.astype(jnp.float32), Wout).reshape(1, WoC)   # f32 bias add

    TH = _row_tile(Hout)
    grid = (N, Hout // TH)

    kernel = functools.partial(_conv_block_kernel, K=K, stride=stride,
                               dilation=dilation, TH=TH, WoC=WoC)

    out_flat = pl.pallas_call(
        kernel,
        out_shape=jax.ShapeDtypeStruct((N, Hout, WoC), x_nchw.dtype),
        grid_spec=pltpu.PrefetchScalarGridSpec(
            num_scalar_prefetch=0,
            grid=grid,
            in_specs=[
                # Input block index is constant across the row-tile axis, so it
                # is DMA'd once per batch element and revisited across tiles.
                pl.BlockSpec((1, Hp, WpC), lambda n, t: (n, 0, 0)),
                pl.BlockSpec((K, WpC, WoC), lambda n, t: (0, 0, 0)),
                pl.BlockSpec((1, WoC), lambda n, t: (0, 0)),
            ],
            out_specs=pl.BlockSpec((1, TH, WoC), lambda n, t: (n, t, 0)),
        ),
        compiler_params=pltpu.CompilerParams(
            dimension_semantics=("parallel", "parallel"),
            vmem_limit_bytes=48 * 1024 * 1024,
        ),
    )(x2, wt, b2)

    out_nhwc = out_flat.reshape(N, Hout, Wout, Cout)
    return jnp.transpose(out_nhwc, (0, 3, 1, 2))                    # back to NCHW


def xavier_uniform(key, out_ch, in_ch, k):
    # matches torch.nn.init.xavier_uniform_ for Conv2d weight (Cout, Cin, K, K)
    fan_in = in_ch * k * k
    fan_out = out_ch * k * k
    bound = math.sqrt(6.0 / (fan_in + fan_out))
    return jax.random.uniform(key, (out_ch, in_ch, k, k),
                              minval=-bound, maxval=bound, dtype=jnp.float32)


if __name__ == "__main__":
    # Config consistent with e.g. _conv_block_(4, 8, 3, 1, 1, True)
    N, Cin, H, W = 2, 4, 16, 16
    Cout, K = 8, 3

    key = jax.random.PRNGKey(0)
    kx, kw = jax.random.split(key)
    x = jax.random.normal(kx, (N, Cin, H, W), dtype=jnp.float32)
    weight = xavier_uniform(kw, Cout, Cin, K)
    bias = jnp.zeros((Cout,), jnp.float32)   # bias.data.zero_()

    def reference(x, w, b, stride, dilation, cdt=jnp.float32):
        pad = dilation * (K - 1) // 2
        r = jax.lax.conv_general_dilated(
            x.astype(cdt), w.astype(cdt),
            window_strides=(stride, stride),
            padding=((pad, pad), (pad, pad)),
            rhs_dilation=(dilation, dilation),
            dimension_numbers=("NCHW", "OIHW", "NCHW"),
            preferred_element_type=jnp.float32)
        r = r + b.reshape(1, -1, 1, 1)
        return jnp.where(r > 0, r, 0.2 * r)

    # f32 path across a few (stride, dilation) configs.
    for (stride, dilation) in [(1, 1), (2, 1), (1, 2)]:
        out = conv_block_pallas(x, weight, bias, stride=stride, dilation=dilation)
        out = jax.block_until_ready(out)
        ref = reference(x, weight, bias, stride, dilation)
        assert out.shape == ref.shape, (out.shape, ref.shape)
        err = float(jnp.max(jnp.abs(out - ref)))
        assert err < 1e-4, (stride, dilation, err)

    # bf16 compute path (f32 accumulation) for v6e/v7x MXU peak.
    out_bf16 = conv_block_pallas(x, weight, bias, stride=1, dilation=1,
                                 compute_dtype=jnp.bfloat16)
    out_bf16 = jax.block_until_ready(out_bf16)
    ref_bf16 = reference(x, weight, bias, 1, 1, cdt=jnp.bfloat16)
    err = float(jnp.max(jnp.abs(out_bf16 - ref_bf16.astype(out_bf16.dtype))))
    assert err < 2e-2, err

    print("KERNEL_OK")
</pallas_src>

<mosaic_0001>
module attributes {stable_mosaic.version = 11 : i64} {
  func.func @_conv_block_kernel(%arg0: i32, %arg1: i32, %arg2: memref<1x18x72xf32, #tpu.memory_space<vmem>>, %arg3: memref<3x72x128xf32, #tpu.memory_space<vmem>>, %arg4: memref<1x128xf32, #tpu.memory_space<vmem>>, %arg5: memref<1x8x128xf32, #tpu.memory_space<vmem>>) attributes {dimension_semantics = [#tpu.dimension_semantics<parallel>, #tpu.dimension_semantics<parallel>], iteration_bounds = array<i64: 2, 2>, scalar_prefetch = 0 : i64, scratch_operands = 0 : i64, tpu.core_type = #tpu.core_type<tc>, window_params = [{transform_indices = @transform_0, window_bounds = array<i64: 1, 18, 72>}, {pipeline_mode = #tpu.pipeline_mode<synchronous>, transform_indices = @transform_1, window_bounds = array<i64: 3, 72, 128>}, {pipeline_mode = #tpu.pipeline_mode<synchronous>, transform_indices = @transform_2, window_bounds = array<i64: 1, 128>}, {transform_indices = @transform_3, window_bounds = array<i64: 1, 8, 128>}]} {
    %c8_i32 = arith.constant 8 : i32
    %0 = arith.muli %arg1, %c8_i32 : i32
    %1 = tpu.assume_multiple %0, 8 : i32
    %cst = arith.constant 0.000000e+00 : f32
    %2 = vector.broadcast %cst : f32 to vector<8x128xf32>
    %c0_i32 = arith.constant 0 : i32
    %3 = arith.addi %1, %c0_i32 : i32
    %c0 = arith.constant 0 : index
    %4 = arith.index_cast %3 : i32 to index
    %c0_0 = arith.constant 0 : index
    %5 = vector.load %arg2[%c0, %4, %c0_0] : memref<1x18x72xf32, #tpu.memory_space<vmem>>, vector<1x8x72xf32>
    %6 = vector.shape_cast %5 : vector<1x8x72xf32> to vector<8x72xf32>
    %c0_1 = arith.constant 0 : index
    %c0_2 = arith.constant 0 : index
    %c0_3 = arith.constant 0 : index
    %7 = vector.load %arg3[%c0_1, %c0_2, %c0_3] : memref<3x72x128xf32, #tpu.memory_space<vmem>>, vector<1x72x128xf32>
    %8 = vector.shape_cast %7 : vector<1x72x128xf32> to vector<72x128xf32>
    %cst_4 = arith.constant dense<0.000000e+00> : vector<8x128xf32>
    %9 = tpu.matmul %6, %8, %cst_4 {dimension_numbers = #tpu.dot_dimension_numbers<[1], [0], [0], [1], [0, 0, 1, 1], [], []>} : vector<8x72xf32>, vector<72x128xf32>, vector<8x128xf32> -> vector<8x128xf32>
    %10 = arith.addf %2, %9 : vector<8x128xf32>
    %c1_i32 = arith.constant 1 : i32
    %11 = arith.addi %1, %c1_i32 : i32
    %c0_5 = arith.constant 0 : index
    %12 = arith.index_cast %11 : i32 to index
    %c0_6 = arith.constant 0 : index
    %13 = vector.load %arg2[%c0_5, %12, %c0_6] : memref<1x18x72xf32, #tpu.memory_space<vmem>>, vector<1x8x72xf32>
    %14 = vector.shape_cast %13 : vector<1x8x72xf32> to vector<8x72xf32>
    %c1 = arith.constant 1 : index
    %c0_7 = arith.constant 0 : index
    %c0_8 = arith.constant 0 : index
    %15 = vector.load %arg3[%c1, %c0_7, %c0_8] : memref<3x72x128xf32, #tpu.memory_space<vmem>>, vector<1x72x128xf32>
    %16 = vector.shape_cast %15 : vector<1x72x128xf32> to vector<72x128xf32>
    %cst_9 = arith.constant dense<0.000000e+00> : vector<8x128xf32>
    %17 = tpu.matmul %14, %16, %cst_9 {dimension_numbers = #tpu.dot_dimension_numbers<[1], [0], [0], [1], [0, 0, 1, 1], [], []>} : vector<8x72xf32>, vector<72x128xf32>, vector<8x128xf32> -> vector<8x128xf32>
    %18 = arith.addf %10, %17 : vector<8x128xf32>
    %c2_i32 = arith.constant 2 : i32
    %19 = arith.addi %1, %c2_i32 : i32
    %c0_10 = arith.constant 0 : index
    %20 = arith.index_cast %19 : i32 to index
    %c0_11 = arith.constant 0 : index
    %21 = vector.load %arg2[%c0_10, %20, %c0_11] : memref<1x18x72xf32, #tpu.memory_space<vmem>>, vector<1x8x72xf32>
    %22 = vector.shape_cast %21 : vector<1x8x72xf32> to vector<8x72xf32>
    %c2 = arith.constant 2 : index
    %c0_12 = arith.constant 0 : index
    %c0_13 = arith.constant 0 : index
    %23 = vector.load %arg3[%c2, %c0_12, %c0_13] : memref<3x72x128xf32, #tpu.memory_space<vmem>>, vector<1x72x128xf32>
    %24 = vector.shape_cast %23 : vector<1x72x128xf32> to vector<72x128xf32>
    %cst_14 = arith.constant dense<0.000000e+00> : vector<8x128xf32>
    %25 = tpu.matmul %22, %24, %cst_14 {dimension_numbers = #tpu.dot_dimension_numbers<[1], [0], [0], [1], [0, 0, 1, 1], [], []>} : vector<8x72xf32>, vector<72x128xf32>, vector<8x128xf32> -> vector<8x128xf32>
    %26 = arith.addf %18, %25 : vector<8x128xf32>
    %c0_15 = arith.constant 0 : index
    %c0_16 = arith.constant 0 : index
    %27 = vector.load %arg4[%c0_15, %c0_16] : memref<1x128xf32, #tpu.memory_space<vmem>>, vector<1x128xf32>
    %28 = vector.broadcast %27 : vector<1x128xf32> to vector<8x128xf32>
    %29 = arith.addf %26, %28 : vector<8x128xf32>
    %cst_17 = arith.constant 0.000000e+00 : f32
    %30 = vector.broadcast %cst_17 : f32 to vector<8x128xf32>
    %31 = arith.cmpf ogt, %29, %30 : vector<8x128xf32>
    %cst_18 = arith.constant 2.000000e-01 : f32
    %32 = vector.broadcast %cst_18 : f32 to vector<8x128xf32>
    %33 = arith.mulf %32, %29 : vector<8x128xf32>
    %34 = arith.select %31, %29, %33 : vector<8x128xi1>, vector<8x128xf32>
    %c0_19 = arith.constant 0 : index
    %c0_20 = arith.constant 0 : index
    %c0_21 = arith.constant 0 : index
    %35 = vector.load %arg5[%c0_19, %c0_20, %c0_21] : memref<1x8x128xf32, #tpu.memory_space<vmem>>, vector<1x8x128xf32>
    %36 = vector.shape_cast %35 : vector<1x8x128xf32> to vector<8x128xf32>
    %37 = vector.shape_cast %34 : vector<8x128xf32> to vector<1x8x128xf32>
    tpu.vector_store %arg5[%c0_19, %c0_20, %c0_21], %37 {strides = array<i32>} : memref<1x8x128xf32, #tpu.memory_space<vmem>>, vector<1x8x128xf32>,
    return
  }
  func.func @transform_0(%arg0: i32, %arg1: i32) -> (i32, i32, i32) {
    %c0_i32 = arith.constant 0 : i32
    %c0_i32_0 = arith.constant 0 : i32
    %c0_i32_1 = arith.constant 0 : i32
    return %arg0, %c0_i32, %c0_i32_0 : i32, i32, i32
  }
  func.func @transform_1(%arg0: i32, %arg1: i32) -> (i32, i32, i32) {
    %c0_i32 = arith.constant 0 : i32
    %c0_i32_0 = arith.constant 0 : i32
    %c0_i32_1 = arith.constant 0 : i32
    %c0_i32_2 = arith.constant 0 : i32
    return %c0_i32, %c0_i32_0, %c0_i32_1 : i32, i32, i32
  }
  func.func @transform_2(%arg0: i32, %arg1: i32) -> (i32, i32) {
    %c0_i32 = arith.constant 0 : i32
    %c0_i32_0 = arith.constant 0 : i32
    %c0_i32_1 = arith.constant 0 : i32
    return %c0_i32, %c0_i32_0 : i32, i32
  }
  func.func @transform_3(%arg0: i32, %arg1: i32) -> (i32, i32, i32) {
    %c0_i32 = arith.constant 0 : i32
    %c0_i32_0 = arith.constant 0 : i32
    return %arg0, %arg1, %c0_i32 : i32, i32, i32
  }
}

</mosaic_0001>

<bundles_post_ra>
// kernel: tpu_custom_call.1
= control target key start
LH: loop header
LB: loop body
LE: loop exit
PB: predicated region body
PF: predicated region fallthrough
CT: control target
= control target key end

     0   :  { %8 = vsyncpa [#allocation3], 0  ;;  %s834_s0 = inlined_call_operand.vmem [shape: f32[2,18,72], index: 0, kind: input, shape index: {}]   ;;  %s835_s1 = inlined_call_operand.hbm [shape: f32[3,72,128], index: 1, kind: input, shape index: {}]   ;;  %s836_s2 = inlined_call_operand.vmem [shape: f32[1,128], index: 2, kind: input, shape index: {}]   ;;  %s837_s3 = inlined_call_operand.hbm [shape: f32[2,16,128], index: 3, kind: output, shape index: {}]  }
   0x1   :  { %9 = vsyncpa [#allocation4], 0 }
   0x2   :  { %11 = vsyncpa [#allocation4 + $0x1], 0  ;;  %s689_s12 = smov 0   ;;  %s691_s13 = smov 0  }
   0x3   :  { %s693_s14 = smov 0   ;;  %s695_s15 = smov 0  }
   0x4   :  { %s697_s16 = smov 0   ;;  %s699_s17 = smov 0  }
   0x5   :  { %s701_s18 = smov 0   ;;  %s703_s19 = smov 0  }
   0x6 LB: > { %s428_s20 = sadd.s32 4294967295, %s664_s19   ;;  %s429_s21 = sadd.s32 4294967294, %s664_s19   ;;  %s664_s19 = sphi %s703_s19, %s17_s19   ;;  %s660_s18 = sphi %s701_s18, %s848_s18   ;;  %s656_s17 = sphi %s699_s17, %s847_s17   ;;  %s652_s16 = sphi %s697_s16, %s846_s16   ;;  %s648_s15 = sphi %s695_s15, %s845_s15   ;;  %s644_s14 = sphi %s693_s14, %s844_s14   ;;  %s640_s13 = sphi %s691_s13, %s843_s13   ;;  %s636_s12 = sphi %s689_s12, %s842_s12  }
   0x7   : > { %s26_s22 = sadd.s32 1, %s656_s17  ;;  %s29_s23 = sadd.s32 1, %s660_s18 }
   0x8   : > { %p27_p0 = scmp.ge.s32.totalorder %s26_s22, 2  ;;  %s106_s24 = sadd.s32 1, %s644_s14 }
   0x9   : > { %p116_p1 = scmp.ne.s32.totalorder %s644_s14, %s640_s13  ;;  %p117_p2 = scmp.eq.s32.totalorder %s428_s20, 3 }
   0xa   : > { %s850_s22 = smov (%p27_p0, %s26_s22), 0  ;;  %s852_s23 = smov (!%p27_p0, %s29_s23), %s660_s18 }
   0xb   : > { %s102_s25 = ssub.s32 %s656_s17, %s850_s22  ;;  %p741_p3 = por %p117_p2, %p116_p1 }
   0xc   : > { %p31_p4 = scmp.ge.s32.totalorder %s852_s23, 2  ;;  %p122_p5 = scmp.ne.s32.totalorder %s640_s13, %s636_s12 }
   0xd   : > { %p123_p6 = scmp.eq.s32.totalorder %s429_s21, 3  ;;  %p430_p7 = scmp.ge.s32.totalorder %s664_s19, 1 }
   0xe   : > { %s854_s23 = smov (%p31_p4, %s852_s23), 0  ;;  %p130_p9 = scmp.lt.s32.totalorder %s664_s19, 5 }
   0xf   : > { %p750_p8 = por %p123_p6, %p122_p5  ;;  %s101_s28 = ssub.s32 %s660_s18, %s854_s23 }
  0x10   : > { %s103_s29 = sor.u32 %s102_s25, %s101_s28  ;;  %p757_p10 = pnand %p430_p7, %p130_p9 }
  0x11   : > { %p104_p11 = scmp.eq.s32.totalorder %s103_s29, 0  ;;  %p761_p12 = scmp.eq.s32.totalorder %s428_s20, 0 }
  0x12   : > { %p457_p13 = pneg %p757_p10  ;;  %s141_s7 = sshll.u32 %s835_s1, 4  ;;  %s142_s7 = int_to_ptr.hbm [resolvable:$true] %s141_s7 }
  0x13   : > { %s771_s8 = scalar_select %p104_p11, %s644_s14, %s106_s24  }
  0x14   : > { %s666_s9 = smov [#allocation2]   ;;  %p458_p0 = pnand %p761_p12, %p457_p13 }
  0x15   : > { %s143_s10 = sshll.u32 %s666_s9, 4  ;;  %s667_s11 = smov 128   ;;  %s144_s10 = int_to_ptr.vmem [resolvable:$true] %s143_s10 }
  0x16   : > { %s668_s20 = smov 8   ;;  %170 = sbr.rel (%p757_p10) target bundleno = 188 (0xbc), region = 32 }
  0x17   : > { %460 = dma.hbm_to_vmem [thread:$0]  (!%p458_p0), %s142_s7, 3456, %s144_s10, [#allocation3], %s667_s11, %s667_s11, %s668_s20  }
  0x1b   : > { %627 = dma.done.wait (%p761_p12), [#allocation3], 3456  }
  0x1c   : > { %629 = vsyncadd (%p761_p12), [#allocation3], 4294963840  ;;  %p195_p1 = scmp.lt.s32.totalorder %s652_s16, 1  ;;  %v284_v0 = vld [vmem:[#allocation2 + $0xd0] sm:$0xff]  ;;  %v283_v1 = vld [vmem:[#allocation2 + $0xc8] sm:$0xff]  ;;  %s437_s30 = sshll.u32 %s648_s15, 3 }
  0x1d   : > { %v224_v2 = vld [vmem:[#allocation2 + $0x88] sm:$0xff]  ;;  %295 = vmatpush.msra.mxu2 %v284_v0  ;;  %v211_v3 = vld [vmem:[#allocation2 + $0x40] sm:$0xff]  ;;  %v210_v6 = vld [vmem:[#allocation2 + $0x38] sm:$0xff]  ;;  %vm225_vm0 = vcmask 588800   ;;  %s446_s5 = sshll.u32 %s652_s16, 1  ;;  %s192_s6 = sand.u32 1, %s640_s13  }
  0x1e   : > { %236 = vmatpush.msra.mxu0 %v224_v2  ;;  %v223_v4 = vld [vmem:[#allocation2 + $0x80] sm:$0xff]  ;;  %s196_s21 = scalar_select %p195_p1, %s652_s16, 1  ;;  %259 = vmatpush.msra.mxu1 %v211_v3  ;;  %v222_v7 = vld [vmem:[#allocation2 + $0x78] sm:$0xff]  ;;  %v209_v8 = vld [vmem:[#allocation2 + $0x30] sm:$0xff] }
  0x1f   : > { %v282_v5 = vld [vmem:[#allocation2 + $0xc0] sm:$0xff]  ;;  %296 = vmatpush.msra.mxu2 %v283_v1  ;;  %v281_v9 = vld [vmem:[#allocation2 + $0xb8] sm:$0xff]  ;;  %v221_v10 = vld [vmem:[#allocation2 + $0x70] sm:$0xff]  ;;  %s329_s7 = sadd.s32 %s648_s15, %s446_s5  ;;  %s435_s9 = sshll.u32 %s192_s6, 3 }
  0x20   : > { %237 = vmatpush.msra.mxu0 %v223_v4  ;;  %260 = vmatpush.msra.mxu1 %v210_v6  ;;  %v208_v11 = vld [vmem:[#allocation2 + $0x28] sm:$0xff]  ;;  %s450_s24 = smul.u32 24, %s196_s21  ;;  %v280_v12 = vld [vmem:[#allocation2 + $0xb0] sm:$0xff]  ;;  %v207_v14 = vld [vmem:[#allocation2 + $0x20] sm:$0xff]  ;;  %s447_s10 = sshll.u32 %s329_s7, 3 }
  0x21   : > { %297 = vmatpush.msra.mxu2 %v282_v5  ;;  %v220_v13 = vld [vmem:[#allocation2 + $0x68] sm:$0xff]  ;;  %v219_v16 = vld [vmem:[#allocation2 + $0x60] sm:$0xff]  ;;  %v206_v17 = vld [vmem:[#allocation2 + $0x18] sm:$0xff]  ;;  %s331_s25 = scalar_lea.hbm %s837_s3, %s447_s10  ;;  %s194_s16 = scalar_lea.vmem [#allocation5], %s435_s9 }
  0x22   : > { %238 = vmatpush.msra.mxu0 %v222_v7  ;;  %261 = vmatpush.msra.mxu1 %v209_v8  ;;  %v279_v15 = vld [vmem:[#allocation2 + $0xa8] sm:$0xff]  ;;  %s199_s29 = scalar_lea.vmem %s834_s0, %s450_s24  ;;  %v278_v18 = vld [vmem:[#allocation2 + $0xa0] sm:$0xff]  ;;  %v218_v19 = vld [vmem:[#allocation2 + $0x58] sm:$0xff]  ;;  %s333_s28 = sshll.u32 %s194_s16, 4  ;;  %s334_s28 = int_to_ptr.vmem [resolvable:$true] %s333_s28 }
  0x23   : > { %298 = vmatpush.msra.mxu2 %v281_v9  ;;  %v205_v20 = vld [vmem:[#allocation2 + $0x10] sm:$0xff]  ;;  %v277_v21 = vld [vmem:[#allocation2 + $0x98] sm:$0xff]  ;;  %s201_s4 = scalar_lea.vmem %s199_s29, %s437_s30  ;;  %v204_v23 = vld [vmem:[#allocation2 + $0x8] sm:$0xff]  ;;  %s335_s15 = sshll.u32 %s331_s25, 4  ;;  %s336_s15 = int_to_ptr.hbm [resolvable:$true] %s335_s15 }
  0x24   : > { %239 = vmatpush.msra.mxu0 %v221_v10  ;;  %262 = vmatpush.msra.mxu1 %v208_v11  ;;  %v217_v22 = vld [vmem:[#allocation2 + $0x50] sm:$0xff]  ;;  %v216_v25 = vld [vmem:[#allocation2 + $0x48] sm:$0xff]  ;;  %v203_v27 = vld [vmem:[#allocation2] sm:$0xff]  ;;  %s319_s29 = scalar_lea.sflag [#allocation4], %s192_s6  ;;  %s580_s30 = sshra.s32 %s336_s15, 4  ;;  %s581_s30 = int_to_ptr.hbm [resolvable:$true] %s580_s30 }
  0x25   : > { %299 = vmatpush.msra.mxu2 %v280_v12  ;;  %v276_v24 = vld [vmem:[#allocation2 + $0x90] sm:$0xff]  ;;  %v443_v26 = vld [vmem:[%s201_s4 + $0x2] sm:$0xff]  ;;  %v535_v33 = vld [vmem:[%s836_s2] ss:$0 sm:$0xff]  ;;  %s586_s9 = scalar_lea.hbm %s837_s3, 32  ;;  %p587_p6 = scmp.lt.s32.totalorder %s581_s30, %s837_s3 }
  0x26   : > { %240 = vmatpush.msra.mxu0 %v220_v13  ;;  %263 = vmatpush.msra.mxu1 %v207_v14  ;;  %v439_v28 = vld [vmem:[%s201_s4 + $0x1] sm:$0xff] }
  0x27   : > { %300 = vmatpush.msra.mxu2 %v279_v15  ;;  %v202_v29 = vld [vmem:[%s201_s4] sm:$0xff]  ;;  %s582_s4 = scalar_lea.hbm %s581_s30, 8 }
  0x28   : > { %241 = vmatpush.msra.mxu0 %v219_v16  ;;  %264 = vmatpush.msra.mxu1 %v206_v17  ;;  %p583_p2 = scmp.ne.s32.totalorder %s581_s30, %s582_s4  ;;  %p588_p7 = scmp.lt.s32.totalorder %s586_s9, %s582_s4 }
  0x29   : > { %301 = vmatpush.msra.mxu2 %v278_v18 }
  0x2a   : > { %242 = vmatpush.msra.mxu0 %v218_v19  ;;  %265 = vmatpush.msra.mxu1 %v205_v20  ;;  %p584_p4 = pnand %p583_p2, %p741_p3  ;;  %p589_p9 = por %p588_p7, %p587_p6 }
  0x2b   : > { %302 = vmatpush.msra.mxu2 %v277_v21 }
  0x2c   : > { %243 = vmatpush.msra.mxu0 %v217_v22  ;;  %266 = vmatpush.msra.mxu1 %v204_v23  ;;  %p585_p5 = pneg %p584_p4 }
  0x2d   : > { %303 = vmatpush.msra.mxu2 %v276_v24 }
  0x2e   : > { %244 = vmatpush.msra.mxu0 %v216_v25  ;;  %444 = vmatmul.msk.f32.vlgmr.msra.gmra.mxu2 %vm225_vm0, %v443_v26  ;;  %p590_p10 = pnand %p589_p9, %p585_p5 }
  0x2f   : > { %267 = vmatpush.msra.mxu1 %v203_v27  ;;  %440 = vmatmul.msk.f32.vlgmr.msra.gmra.mxu0 %vm225_vm0, %v439_v28 }
  0x30   : > { %441 = vmatmul.msk.f32.vlgmr.msra.gmra.mxu1 %vm225_vm0, %v202_v29 }
  0xac   : > { %v246_v30 = vpop.f32.mrf.mxu0 }
  0xad   : > { %v269_v31 = vpop.f32.mrf.mxu1 }
  0xae   : > { %v270_v32 = vadd.f32 %v269_v31, %v246_v30 }
  0xb1   : > { %v305_v34 = vpop.f32.mrf.mxu2 }
  0xb2   : > { %v308_v35 = vadd.f32 %v305_v34, %v270_v32 }
  0xb4   : > { %v313_v36 = vadd.f32 %v535_v33, %v308_v35 }
  0xb6   : > { %vm314_vm1 = vcmp.gt.f32.partialorder %v313_v36, 0.0  ;;  %v315_v37 = vmul.f32 0.2, %v313_v36 }
  0xb8   : > { %v316_v38 = vsel %vm314_vm1, %v313_v36, %v315_v37 }
  0xb9   : > { %317 = vst [vmem:[%s194_s16] sm:$0xff] %v316_v38 }
  0xba   : > { %593 = shalt.err (!%p590_p10)
}
  0xbb   : > { %455 = dma.vmem_to_hbm [thread:$0]  (%p741_p3), %s334_s28, 128, %s336_s15, %s319_s29  }
  0xbc PF: > { %p467_p11 = scmp.ge.s32.totalorder %s664_s19, 2  ;;  %s347_s6 = sand.u32 1, %s636_s12  }
  0xbd   : > { %s348_s20 = scalar_lea.sflag [#allocation4], %s347_s6 }
  0xbe   : > { %p462_p12 = pnand %p467_p11, %p750_p8 }
  0xc0   : > { %p463_p13 = pneg %p462_p12 }
  0xc2   : > { %631 = dma.done.wait (%p463_p13), %s348_s20, 128  }
  0xc3   : > { %633 = vsyncadd (%p463_p13), %s348_s20, 4294967168  ;;  %s17_s19 = sadd.s32 1, %s664_s19   ;;  %s842_s12 = smov %s640_s13 }
  0xc4   : > { %p14_p0 = scmp.ge.s32.totalorder %s17_s19, 6   ;;  %s843_s13 = smov %s644_s14 }
  0xc5   : > { %s844_s14 = smov %s771_s8  ;;  %s845_s15 = smov %s656_s17 }
  0xc6   : > { %s846_s16 = smov %s660_s18  ;;  %s847_s17 = smov %s850_s22 }
  0xc7   : > { %s848_s18 = smov %s854_s23  ;;  %16 = sbr.rel (!%p14_p0) target bundleno = 6 (0x6), region = 77 }
  0xcc   :  { %354 = vsyncpa [#allocation3], 1 }
  0xcd   :  { %356 = vsyncpa [#allocation3 + $0x1], 1 }
  0xce   :  { %357 = vsyncpa [#allocation4], 1 }
  0xcf   :  { %359 = vsyncpa [#allocation4 + $0x1], 1 }

</bundles_post_ra>
